<compile_context>
chip_gen: v7x
topology: tpu7x:2x2x1
jax: 0.10.0
libtpu: 0.0.40
codegen_flags: <defaults>
</compile_context>

<pallas_src>
import jax
import jax.numpy as jnp
from jax.experimental import pallas as pl
from jax.experimental.pallas import tpu as pltpu


# ------------------------------- helpers ------------------------------------

def _round_up(n, m):
    return ((n + m - 1) // m) * m


# --------------------------- parameter packing -------------------------------

def pack_vae_params(enc1, enc2, dec, input_size, latent_size, hidden_dims, P):
    """Pack all VAE Linear layers into one (L, P, P) f32 buffer of padded slabs.

    Layout of each slab S (for activation row-vectors h of width P):
        h_next = h @ S        (bias lives in row P-1, picked up by the
                               constant-1 lane of h; S[P-1, P-1] = 1 keeps the
                               constant lane alive through ReLU layers)
    Slab order: [fused enc layer 0..n_h-1, mu head, log_var head, dec 0..]
    """
    c = P - 1  # constant-1 lane
    n_h = len(hidden_dims)
    slabs = []

    def slab():
        return jnp.zeros((P, P), jnp.float32)

    # Fused encoder layer 0:  x -> [enc1_h0 | enc2_h0]
    (w1, b1), (w2, b2) = enc1[0], enc2[0]
    h0 = hidden_dims[0]
    s = slab()
    s = s.at[:input_size, :h0].set(w1)
    s = s.at[:input_size, h0:2 * h0].set(w2)
    s = s.at[c, :h0].set(b1)
    s = s.at[c, h0:2 * h0].set(b2)
    s = s.at[c, c].set(1.0)
    slabs.append(s)

    # Fused encoder hidden layers (block-diagonal)
    for i in range(1, n_h):
        (w1, b1), (w2, b2) = enc1[i], enc2[i]
        prev, cur = hidden_dims[i - 1], hidden_dims[i]
        s = slab()
        s = s.at[:prev, :cur].set(w1)
        s = s.at[prev:2 * prev, cur:2 * cur].set(w2)
        s = s.at[c, :cur].set(b1)
        s = s.at[c, cur:2 * cur].set(b2)
        s = s.at[c, c].set(1.0)
        slabs.append(s)

    h_last = hidden_dims[-1]

    # mu head (enc1's final Linear) — keeps the constant-1 lane alive so it
    # propagates through z = eps*std + mu into the decoder.
    w_mu, b_mu = enc1[-1]
    s = slab()
    s = s.at[:h_last, :latent_size].set(w_mu)
    s = s.at[c, :latent_size].set(b_mu)
    s = s.at[c, c].set(1.0)
    slabs.append(s)

    # log_var head (enc2's final Linear) — reads the enc2 half of the fused act.
    w_lv, b_lv = enc2[-1]
    s = slab()
    s = s.at[h_last:2 * h_last, :latent_size].set(w_lv)
    s = s.at[c, :latent_size].set(b_lv)
    slabs.append(s)

    # Decoder layers (ReLU on all but the last; Sigmoid applied in-kernel).
    for i, (w, b) in enumerate(dec):
        din, dout = w.shape
        s = slab()
        s = s.at[:din, :dout].set(w)
        s = s.at[c, :dout].set(b)
        if i < len(dec) - 1:
            s = s.at[c, c].set(1.0)
        slabs.append(s)

    return jnp.stack(slabs, axis=0)


# --------------------------------- kernel ------------------------------------

def make_vae_kernel(n_enc_hidden, n_dec_layers):
    """Kernel args: (x_ref (TB,P), eps_ref (TB,P), w_ref (L,P,P), out_ref (TB,P))."""

    def kernel(x_ref, eps_ref, w_ref, out_ref):
        h = x_ref[...]
        li = 0

        # Fused encoder trunk (Linear + ReLU), enc1/enc2 side by side in lanes.
        for _ in range(n_enc_hidden):
            h = jnp.maximum(
                jnp.dot(h, w_ref[li], preferred_element_type=jnp.float32), 0.0)
            li += 1

        # mu / log_var heads (bias folded in; padding lanes come out as 0).
        mu = jnp.dot(h, w_ref[li], preferred_element_type=jnp.float32)
        li += 1
        log_var = jnp.dot(h, w_ref[li], preferred_element_type=jnp.float32)
        li += 1

        # Reparameterization: z = eps * exp(0.5 * log_var) + mu
        # eps is zero in padding lanes, so z stays clean; the constant-1 lane
        # of mu carries through so decoder biases keep working.
        z = eps_ref[...] * jnp.exp(0.5 * log_var) + mu

        # Decoder (ReLU on all but the last layer) + Sigmoid.
        h = z
        for j in range(n_dec_layers):
            h = jnp.dot(h, w_ref[li], preferred_element_type=jnp.float32)
            li += 1
            if j < n_dec_layers - 1:
                h = jnp.maximum(h, 0.0)

        out_ref[...] = jax.nn.sigmoid(h)   # lane-dense (TB, P) store

    return kernel


# -------------------------------- wrapper ------------------------------------

def vae_forward(x, eps, enc1, enc2, dec, *, input_size, latent_size, hidden_dims):
    assert len(hidden_dims) >= 1
    B = x.shape[0]

    # Uniform padded width: room for the widest activation plus the const lane.
    max_dim = max([input_size, latent_size] + [2 * h for h in hidden_dims])
    P = _round_up(max_dim + 1, 128)

    w_all = pack_vae_params(enc1, enc2, dec, input_size, latent_size,
                            hidden_dims, P)
    L = w_all.shape[0]

    # Batch tiling: 8-row minimum (sublane), 256-row tiles for large batches.
    TB = 256 if B >= 256 else _round_up(max(B, 1), 8)
    B_pad = _round_up(B, TB)

    # Pad x / eps into lane-dense slabs; lane P-1 of x carries the constant 1.
    x_p = jnp.zeros((B_pad, P), jnp.float32)
    x_p = x_p.at[:B, :input_size].set(x.astype(jnp.float32))
    x_p = x_p.at[:, P - 1].set(1.0)
    eps_p = jnp.zeros((B_pad, P), jnp.float32)
    eps_p = eps_p.at[:B, :latent_size].set(eps.astype(jnp.float32))

    kernel = make_vae_kernel(len(hidden_dims), len(dec))

    out = pl.pallas_call(
        kernel,
        out_shape=jax.ShapeDtypeStruct((B_pad, P), jnp.float32),
        grid_spec=pltpu.PrefetchScalarGridSpec(
            num_scalar_prefetch=0,
            grid=(B_pad // TB,),
            in_specs=[
                pl.BlockSpec((TB, P), lambda i: (i, 0)),      # x tile
                pl.BlockSpec((TB, P), lambda i: (i, 0)),      # eps tile
                pl.BlockSpec((L, P, P), lambda i: (0, 0, 0)),  # packed weights, resident
            ],
            out_specs=pl.BlockSpec((TB, P), lambda i: (i, 0)),
        ),
        compiler_params=pltpu.CompilerParams(
            dimension_semantics=("parallel",)),
    )(x_p, eps_p, w_all)

    return out[:B, :input_size]


# ----------------------------- parameter init --------------------------------

def init_linear(key, in_dim, out_dim):
    """PyTorch-style uniform(-1/sqrt(in), 1/sqrt(in)) init. W is (in, out), b is (out,)."""
    kw, kb = jax.random.split(key)
    bound = 1.0 / (in_dim ** 0.5)
    w = jax.random.uniform(kw, (in_dim, out_dim), jnp.float32, -bound, bound)
    b = jax.random.uniform(kb, (out_dim,), jnp.float32, -bound, bound)
    return w, b


def init_mlp(key, start, hidden, end):
    dims = [start] + list(hidden) + [end]
    keys = jax.random.split(key, len(dims) - 1)
    return [init_linear(k, din, dout)
            for k, din, dout in zip(keys, dims[:-1], dims[1:])]


# ----------------------------- pure-JAX reference ----------------------------

def vae_reference(x, eps, enc1, enc2, dec):
    def mlp(h, params):
        for i, (w, b) in enumerate(params):
            h = h @ w + b
            if i < len(params) - 1:
                h = jnp.maximum(h, 0.0)
        return h

    mu = mlp(x, enc1)
    log_var = mlp(x, enc2)
    z = eps * jnp.exp(0.5 * log_var) + mu
    return jax.nn.sigmoid(mlp(z, dec))


# ---------------------------------- main -------------------------------------

if __name__ == "__main__":
    # Module config (small, consistent with the MLP forward):
    input_size = 64
    latent_size = 8
    hidden_dims = [32, 16]
    batch = 2

    key = jax.random.PRNGKey(0)
    k_x, k_eps, k_e1, k_e2, k_d = jax.random.split(key, 5)

    x = jax.random.uniform(k_x, (batch, input_size), jnp.float32)

    # encoder1 / encoder2: input_size -> hidden_dims -> latent_size
    enc1_params = init_mlp(k_e1, input_size, hidden_dims, latent_size)
    enc2_params = init_mlp(k_e2, input_size, hidden_dims, latent_size)

    # decoder: latent_size -> reversed(hidden_dims) -> input_size  (+ Sigmoid)
    dec_params = init_mlp(k_d, latent_size, list(reversed(hidden_dims)), input_size)

    # eps = torch.randn_like(std): standard normal, shape (batch, latent_size)
    eps = jax.random.normal(k_eps, (batch, latent_size), jnp.float32)

    out = vae_forward(x, eps, enc1_params, enc2_params, dec_params,
                      input_size=input_size, latent_size=latent_size,
                      hidden_dims=hidden_dims)
    out = jax.block_until_ready(out)

    ref = vae_reference(x, eps, enc1_params, enc2_params, dec_params)

    assert out.shape == (batch, input_size)
    assert bool(jnp.all(jnp.isfinite(out)))
    assert bool(jnp.all((out >= 0.0) & (out <= 1.0)))          # sigmoid range
    assert bool(jnp.allclose(out, ref, atol=2e-3, rtol=2e-3))  # matches reference

    print("KERNEL_OK")
</pallas_src>

<mosaic_0001>
module attributes {stable_mosaic.version = 11 : i64} {
  func.func @kernel(%arg0: i32, %arg1: memref<8x128xf32, #tpu.memory_space<vmem>>, %arg2: memref<8x128xf32, #tpu.memory_space<vmem>>, %arg3: memref<7x128x128xf32, #tpu.memory_space<vmem>>, %arg4: memref<8x128xf32, #tpu.memory_space<vmem>>) attributes {dimension_semantics = [#tpu.dimension_semantics<parallel>], iteration_bounds = array<i64: 1>, scalar_prefetch = 0 : i64, scratch_operands = 0 : i64, tpu.core_type = #tpu.core_type<tc>, window_params = [{transform_indices = @transform_0, window_bounds = array<i64: 8, 128>}, {transform_indices = @transform_1, window_bounds = array<i64: 8, 128>}, {pipeline_mode = #tpu.pipeline_mode<synchronous>, transform_indices = @transform_2, window_bounds = array<i64: 7, 128, 128>}, {transform_indices = @transform_3, window_bounds = array<i64: 8, 128>}]} {
    %c0 = arith.constant 0 : index
    %c0_0 = arith.constant 0 : index
    %0 = vector.load %arg1[%c0, %c0_0] : memref<8x128xf32, #tpu.memory_space<vmem>>, vector<8x128xf32>
    %c0_1 = arith.constant 0 : index
    %c0_2 = arith.constant 0 : index
    %c0_3 = arith.constant 0 : index
    %1 = vector.load %arg3[%c0_1, %c0_2, %c0_3] : memref<7x128x128xf32, #tpu.memory_space<vmem>>, vector<1x128x128xf32>
    %2 = vector.shape_cast %1 : vector<1x128x128xf32> to vector<128x128xf32>
    %cst = arith.constant dense<0.000000e+00> : vector<8x128xf32>
    %3 = tpu.matmul %0, %2, %cst {dimension_numbers = #tpu.dot_dimension_numbers<[1], [0], [0], [1], [0, 0, 1, 1], [], []>} : vector<8x128xf32>, vector<128x128xf32>, vector<8x128xf32> -> vector<8x128xf32>
    %cst_4 = arith.constant 0.000000e+00 : f32
    %4 = vector.broadcast %cst_4 : f32 to vector<8x128xf32>
    %5 = arith.maximumf %3, %4 : vector<8x128xf32>
    %c1 = arith.constant 1 : index
    %c0_5 = arith.constant 0 : index
    %c0_6 = arith.constant 0 : index
    %6 = vector.load %arg3[%c1, %c0_5, %c0_6] : memref<7x128x128xf32, #tpu.memory_space<vmem>>, vector<1x128x128xf32>
    %7 = vector.shape_cast %6 : vector<1x128x128xf32> to vector<128x128xf32>
    %cst_7 = arith.constant dense<0.000000e+00> : vector<8x128xf32>
    %8 = tpu.matmul %5, %7, %cst_7 {dimension_numbers = #tpu.dot_dimension_numbers<[1], [0], [0], [1], [0, 0, 1, 1], [], []>} : vector<8x128xf32>, vector<128x128xf32>, vector<8x128xf32> -> vector<8x128xf32>
    %cst_8 = arith.constant 0.000000e+00 : f32
    %9 = vector.broadcast %cst_8 : f32 to vector<8x128xf32>
    %10 = arith.maximumf %8, %9 : vector<8x128xf32>
    %c2 = arith.constant 2 : index
    %c0_9 = arith.constant 0 : index
    %c0_10 = arith.constant 0 : index
    %11 = vector.load %arg3[%c2, %c0_9, %c0_10] : memref<7x128x128xf32, #tpu.memory_space<vmem>>, vector<1x128x128xf32>
    %12 = vector.shape_cast %11 : vector<1x128x128xf32> to vector<128x128xf32>
    %cst_11 = arith.constant dense<0.000000e+00> : vector<8x128xf32>
    %13 = tpu.matmul %10, %12, %cst_11 {dimension_numbers = #tpu.dot_dimension_numbers<[1], [0], [0], [1], [0, 0, 1, 1], [], []>} : vector<8x128xf32>, vector<128x128xf32>, vector<8x128xf32> -> vector<8x128xf32>
    %c3 = arith.constant 3 : index
    %c0_12 = arith.constant 0 : index
    %c0_13 = arith.constant 0 : index
    %14 = vector.load %arg3[%c3, %c0_12, %c0_13] : memref<7x128x128xf32, #tpu.memory_space<vmem>>, vector<1x128x128xf32>
    %15 = vector.shape_cast %14 : vector<1x128x128xf32> to vector<128x128xf32>
    %cst_14 = arith.constant dense<0.000000e+00> : vector<8x128xf32>
    %16 = tpu.matmul %10, %15, %cst_14 {dimension_numbers = #tpu.dot_dimension_numbers<[1], [0], [0], [1], [0, 0, 1, 1], [], []>} : vector<8x128xf32>, vector<128x128xf32>, vector<8x128xf32> -> vector<8x128xf32>
    %c0_15 = arith.constant 0 : index
    %c0_16 = arith.constant 0 : index
    %17 = vector.load %arg2[%c0_15, %c0_16] : memref<8x128xf32, #tpu.memory_space<vmem>>, vector<8x128xf32>
    %cst_17 = arith.constant 5.000000e-01 : f32
    %18 = vector.broadcast %cst_17 : f32 to vector<8x128xf32>
    %19 = arith.mulf %18, %16 : vector<8x128xf32>
    %20 = math.exp %19 : vector<8x128xf32>
    %21 = arith.mulf %17, %20 : vector<8x128xf32>
    %22 = arith.addf %21, %13 : vector<8x128xf32>
    %c4 = arith.constant 4 : index
    %c0_18 = arith.constant 0 : index
    %c0_19 = arith.constant 0 : index
    %23 = vector.load %arg3[%c4, %c0_18, %c0_19] : memref<7x128x128xf32, #tpu.memory_space<vmem>>, vector<1x128x128xf32>
    %24 = vector.shape_cast %23 : vector<1x128x128xf32> to vector<128x128xf32>
    %cst_20 = arith.constant dense<0.000000e+00> : vector<8x128xf32>
    %25 = tpu.matmul %22, %24, %cst_20 {dimension_numbers = #tpu.dot_dimension_numbers<[1], [0], [0], [1], [0, 0, 1, 1], [], []>} : vector<8x128xf32>, vector<128x128xf32>, vector<8x128xf32> -> vector<8x128xf32>
    %cst_21 = arith.constant 0.000000e+00 : f32
    %26 = vector.broadcast %cst_21 : f32 to vector<8x128xf32>
    %27 = arith.maximumf %25, %26 : vector<8x128xf32>
    %c5 = arith.constant 5 : index
    %c0_22 = arith.constant 0 : index
    %c0_23 = arith.constant 0 : index
    %28 = vector.load %arg3[%c5, %c0_22, %c0_23] : memref<7x128x128xf32, #tpu.memory_space<vmem>>, vector<1x128x128xf32>
    %29 = vector.shape_cast %28 : vector<1x128x128xf32> to vector<128x128xf32>
    %cst_24 = arith.constant dense<0.000000e+00> : vector<8x128xf32>
    %30 = tpu.matmul %27, %29, %cst_24 {dimension_numbers = #tpu.dot_dimension_numbers<[1], [0], [0], [1], [0, 0, 1, 1], [], []>} : vector<8x128xf32>, vector<128x128xf32>, vector<8x128xf32> -> vector<8x128xf32>
    %cst_25 = arith.constant 0.000000e+00 : f32
    %31 = vector.broadcast %cst_25 : f32 to vector<8x128xf32>
    %32 = arith.maximumf %30, %31 : vector<8x128xf32>
    %c6 = arith.constant 6 : index
    %c0_26 = arith.constant 0 : index
    %c0_27 = arith.constant 0 : index
    %33 = vector.load %arg3[%c6, %c0_26, %c0_27] : memref<7x128x128xf32, #tpu.memory_space<vmem>>, vector<1x128x128xf32>
    %34 = vector.shape_cast %33 : vector<1x128x128xf32> to vector<128x128xf32>
    %cst_28 = arith.constant dense<0.000000e+00> : vector<8x128xf32>
    %35 = tpu.matmul %32, %34, %cst_28 {dimension_numbers = #tpu.dot_dimension_numbers<[1], [0], [0], [1], [0, 0, 1, 1], [], []>} : vector<8x128xf32>, vector<128x128xf32>, vector<8x128xf32> -> vector<8x128xf32>
    %36 = arith.negf %35 : vector<8x128xf32>
    %37 = math.exp %36 : vector<8x128xf32>
    %cst_29 = arith.constant 1.000000e+00 : f32
    %38 = vector.broadcast %cst_29 : f32 to vector<8x128xf32>
    %39 = arith.addf %38, %37 : vector<8x128xf32>
    %40 = arith.divf %38, %39 : vector<8x128xf32>
    %c0_30 = arith.constant 0 : index
    %c0_31 = arith.constant 0 : index
    %41 = vector.load %arg4[%c0_30, %c0_31] : memref<8x128xf32, #tpu.memory_space<vmem>>, vector<8x128xf32>
    tpu.vector_store %arg4[%c0_30, %c0_31], %40 {strides = array<i32>} : memref<8x128xf32, #tpu.memory_space<vmem>>, vector<8x128xf32>,
    return
  }
  func.func @transform_0(%arg0: i32) -> (i32, i32) {
    %c0_i32 = arith.constant 0 : i32
    %c0_i32_0 = arith.constant 0 : i32
    return %arg0, %c0_i32 : i32, i32
  }
  func.func @transform_1(%arg0: i32) -> (i32, i32) {
    %c0_i32 = arith.constant 0 : i32
    %c0_i32_0 = arith.constant 0 : i32
    return %arg0, %c0_i32 : i32, i32
  }
  func.func @transform_2(%arg0: i32) -> (i32, i32, i32) {
    %c0_i32 = arith.constant 0 : i32
    %c0_i32_0 = arith.constant 0 : i32
    %c0_i32_1 = arith.constant 0 : i32
    %c0_i32_2 = arith.constant 0 : i32
    return %c0_i32, %c0_i32_0, %c0_i32_1 : i32, i32, i32
  }
  func.func @transform_3(%arg0: i32) -> (i32, i32) {
    %c0_i32 = arith.constant 0 : i32
    %c0_i32_0 = arith.constant 0 : i32
    return %arg0, %c0_i32 : i32, i32
  }
}

</mosaic_0001>

<bundles_post_ra>
// kernel: tpu_custom_call.1
= control target key start
LH: loop header
LB: loop body
LE: loop exit
PB: predicated region body
PF: predicated region fallthrough
CT: control target
= control target key end

     0   :  { %8 = vsyncpa [#allocation3], 0  ;;  %s1483_s0 = inlined_call_operand.hbm [shape: f32[8,128], index: 0, kind: input, shape index: {}]   ;;  %s1484_s1 = inlined_call_operand.hbm [shape: f32[8,128], index: 1, kind: input, shape index: {}]   ;;  %s1485_s2 = inlined_call_operand.hbm [shape: f32[7,128,128], index: 2, kind: input, shape index: {}]   ;;  %s1486_s3 = inlined_call_operand.hbm [shape: f32[8,128], index: 3, kind: output, shape index: {}]  }
   0x1   :  { %9 = vsyncpa [#allocation6], 0 }
   0x2   :  { %10 = vsyncpa [#allocation4], 0  ;;  %s1336_s12 = smov [#allocation5]   ;;  %s1337_s14 = smov [#allocation2]  }
   0x3   :  { %s27_s13 = sshll.u32 %s1336_s12, 4  ;;  %s17_s15 = sshll.u32 %s1337_s14, 4  ;;  %s28_s13 = int_to_ptr.vmem [resolvable:$true] %s27_s13  ;;  %s18_s15 = int_to_ptr.vmem [resolvable:$true] %s17_s15 }
   0x4   :  { %s1242_s18 = scalar_lea.hbm %s1484_s1, 128 }
   0x5   :  { %p1243_p0 = scmp.ne.s32.totalorder %s1484_s1, %s1242_s18  ;;  %p1246_p1 = scmp.lt.u32.totalorder %s1242_s18, %s1484_s1 }
   0x7   :  { %p1248_p2 = pnand %p1246_p1, %p1243_p0 }
   0x9   :  { %1251 = shalt.err (!%p1248_p2)
}
   0xa   :  { %s1252_s23 = scalar_lea.vmem %s28_s13, 128  ;;  %p1257_p4 = scmp.lt.s32.totalorder %s28_s13, %s28_s13 }
   0xb   :  { %p1253_p3 = scmp.ne.s32.totalorder %s28_s13, %s1252_s23  ;;  %p1258_p5 = scmp.lt.s32.totalorder %s1252_s23, %s1252_s23 }
   0xd   :  { %p1259_p6 = por %p1258_p5, %p1257_p4 }
   0xf   :  { %p1260_p7 = pnand %p1259_p6, %p1253_p3 }
  0x11   :  { %1263 = shalt.err (!%p1260_p7)
}
  0x12   :  { %30 = dma.hbm_to_vmem [thread:$0]  %s1484_s1, 128, %s28_s13, [#allocation6]  }
  0x13   :  { %s1264_s28 = scalar_lea.hbm %s1483_s0, 128 }
  0x14   :  { %p1265_p8 = scmp.ne.s32.totalorder %s1483_s0, %s1264_s28  ;;  %p1268_p9 = scmp.lt.u32.totalorder %s1264_s28, %s1483_s0 }
  0x16   :  { %p1270_p10 = pnand %p1268_p9, %p1265_p8 }
  0x18   :  { %1273 = shalt.err (!%p1270_p10)
}
  0x19   :  { %s1274_s6 = scalar_lea.vmem %s18_s15, 128  ;;  %p1279_p12 = scmp.lt.s32.totalorder %s18_s15, %s18_s15 }
  0x1a   :  { %p1275_p11 = scmp.ne.s32.totalorder %s18_s15, %s1274_s6  ;;  %p1280_p13 = scmp.lt.s32.totalorder %s1274_s6, %s1274_s6 }
  0x1c   :  { %p1281_p0 = por %p1280_p13, %p1279_p12 }
  0x1e   :  { %p1282_p1 = pnand %p1281_p0, %p1275_p11 }
  0x20   :  { %1285 = shalt.err (!%p1282_p1)
}
  0x21   :  { %20 = dma.hbm_to_vmem [thread:$0]  %s1483_s0, 128, %s18_s15, [#allocation3]  }
  0x22   :  { %s1338_s8 = smov [#allocation7]   ;;  %s1286_s12 = scalar_lea.hbm %s1485_s2, 14336 }
  0x23   :  { %s36_s9 = sshll.u32 %s1338_s8, 4  ;;  %p1287_p2 = scmp.ne.s32.totalorder %s1485_s2, %s1286_s12  ;;  %s37_s9 = int_to_ptr.vmem [resolvable:$true] %s36_s9 }
  0x24   :  { %p1290_p3 = scmp.lt.u32.totalorder %s1286_s12, %s1485_s2 }
  0x26   :  { %p1292_p4 = pnand %p1290_p3, %p1287_p2 }
  0x28   :  { %1295 = shalt.err (!%p1292_p4)
}
  0x29   :  { %s1296_s18 = scalar_lea.vmem %s37_s9, 14336  ;;  %p1301_p6 = scmp.lt.s32.totalorder %s37_s9, %s37_s9 }
  0x2a   :  { %p1297_p5 = scmp.ne.s32.totalorder %s37_s9, %s1296_s18  ;;  %p1302_p7 = scmp.lt.s32.totalorder %s1296_s18, %s1296_s18 }
  0x2c   :  { %p1303_p8 = por %p1302_p7, %p1301_p6 }
  0x2e   :  { %p1304_p9 = pnand %p1303_p8, %p1297_p5 }
  0x30   :  { %1307 = shalt.err (!%p1304_p9)
}
  0x31   :  { %s1339_s0 = smov 128   ;;  %s1340_s15 = smov 8  }
  0x32   :  { %42 = dma.hbm_to_vmem [thread:$0]  %s1485_s2, 14336, %s37_s9, [#allocation6], %s1339_s0, %s1339_s0, %s1340_s15  }
  0x33   :  { %1330 = dma.done.wait [#allocation3], 128  }
  0x34   :  { %1331 = vsyncadd [#allocation3], 4294967168 }
  0x35   :  { %1332 = dma.done.wait [#allocation6], 14464  }
  0x36   :  { %1333 = vsyncadd [#allocation6], 4294952832  ;;  %v1341_v0 = vmov 0.0|0.0   ;;  %vm1342_vm0 = vmmov 0   ;;  %v1343_v1 = vmov 0.0   ;;  %v53_v2 = vld [vmem:[#allocation7] sm:$0xff] }
  0x37   :  { %1059 = vmatprep.subr.bf16.mxu0 %v1341_v0  ;;  %846 = vmatprep.mubr.msk.f32.mxu0 %vm1342_vm0, %v1343_v1  ;;  %v54_v3 = vld [vmem:[#allocation7 + $0x8] sm:$0xff]  ;;  %v55_v4 = vld [vmem:[#allocation7 + $0x10] sm:$0xff]  ;;  %v56_v6 = vld [vmem:[#allocation7 + $0x18] sm:$0xff]  ;;  %s1344_s2 = smov [#allocation8]  }
  0x38   :  { %1083 = vmatprep.subr.bf16.mxu1 %v1341_v0  ;;  %881 = vmatprep.mubr.msk.f32.mxu1 %vm1342_vm0, %v1343_v1  ;;  %v1060_v5 = vpack.c.bf16 %v54_v3, %v53_v2  ;;  %v1063_v7 = vpack.c.bf16 %v56_v6, %v55_v4  ;;  %v57_v8 = vld [vmem:[#allocation7 + $0x20] sm:$0xff]  ;;  %v58_v9 = vld [vmem:[#allocation7 + $0x28] sm:$0xff]  ;;  %v143_v12 = vld [vmem:[#allocation7 + $0x90] sm:$0xff]  ;;  %s684_s21 = sshll.u32 %s1344_s2, 4  ;;  %s685_s21 = int_to_ptr.vmem [resolvable:$true] %s684_s21 }
  0x39   :  { %v141_v10 = vld [vmem:[#allocation7 + $0x80] sm:$0xff]  ;;  %v142_v11 = vld [vmem:[#allocation7 + $0x88] sm:$0xff]  ;;  %v144_v13 = vld [vmem:[#allocation7 + $0x98] sm:$0xff]  ;;  %v1066_v14 = vpack.c.bf16 %v58_v9, %v57_v8  ;;  %s1308_s22 = scalar_lea.vmem %s685_s21, 128  ;;  %p1313_p11 = scmp.lt.s32.totalorder %s685_s21, %s685_s21 }
  0x3a   :  { %1061 = vmatpush3.bf16.msra.mxu0 %v1060_v5  ;;  %v1084_v15 = vpack.c.bf16 %v142_v11, %v141_v10  ;;  %v59_v16 = vld [vmem:[#allocation7 + $0x30] sm:$0xff]  ;;  %v60_v17 = vld [vmem:[#allocation7 + $0x38] sm:$0xff]  ;;  %v1087_v18 = vpack.c.bf16 %v144_v13, %v143_v12  ;;  %v145_v19 = vld [vmem:[#allocation7 + $0xa0] sm:$0xff]  ;;  %p1309_p10 = scmp.ne.s32.totalorder %s685_s21, %s1308_s22  ;;  %p1314_p12 = scmp.lt.s32.totalorder %s1308_s22, %s1308_s22 }
  0x3b   :  { %1062 = vmatprep.subr.bf16.mxu0 %v1341_v0  ;;  %v146_v20 = vld [vmem:[#allocation7 + $0xa8] sm:$0xff]  ;;  %v1069_v21 = vpack.c.bf16 %v60_v17, %v59_v16  ;;  %v61_v22 = vld [vmem:[#allocation7 + $0x40] sm:$0xff]  ;;  %v147_v25 = vld [vmem:[#allocation7 + $0xb0] sm:$0xff] }
  0x3c   :  { %1085 = vmatpush3.bf16.msra.mxu1 %v1084_v15  ;;  %v62_v23 = vld [vmem:[#allocation7 + $0x48] sm:$0xff]  ;;  %v1090_v24 = vpack.c.bf16 %v146_v20, %v145_v19  ;;  %v148_v26 = vld [vmem:[#allocation7 + $0xb8] sm:$0xff]  ;;  %v63_v28 = vld [vmem:[#allocation7 + $0x50] sm:$0xff]  ;;  %p1315_p13 = por %p1314_p12, %p1313_p11 }
  0x3d   :  { %1086 = vmatprep.subr.bf16.mxu1 %v1341_v0  ;;  %v1072_v27 = vpack.c.bf16 %v62_v23, %v61_v22  ;;  %v64_v29 = vld [vmem:[#allocation7 + $0x58] sm:$0xff]  ;;  %v1093_v30 = vpack.c.bf16 %v148_v26, %v147_v25  ;;  %v149_v31 = vld [vmem:[#allocation7 + $0xc0] sm:$0xff]  ;;  %v150_v32 = vld [vmem:[#allocation7 + $0xc8] sm:$0xff] }
  0x3e   :  { %1064 = vmatpush3.bf16.msra.mxu0 %v1063_v7  ;;  %v1075_v33 = vpack.c.bf16 %v64_v29, %v63_v28  ;;  %v65_v34 = vld [vmem:[#allocation7 + $0x60] sm:$0xff]  ;;  %v66_v35 = vld [vmem:[#allocation7 + $0x68] sm:$0xff]  ;;  %v1096_v36 = vpack.c.bf16 %v150_v32, %v149_v31  ;;  %v151_v37 = vld [vmem:[#allocation7 + $0xd0] sm:$0xff]  ;;  %p1316_p0 = pnand %p1315_p13, %p1309_p10 }
  0x3f   :  { %1065 = vmatprep.subr.bf16.mxu0 %v1341_v0  ;;  %v152_v38 = vld [vmem:[#allocation7 + $0xd8] sm:$0xff]  ;;  %v1078_v39 = vpack.c.bf16 %v66_v35, %v65_v34  ;;  %v67_v40 = vld [vmem:[#allocation7 + $0x70] sm:$0xff]  ;;  %v153_v43 = vld [vmem:[#allocation7 + $0xe0] sm:$0xff] }
  0x40   :  { %1088 = vmatpush3.bf16.msra.mxu1 %v1087_v18  ;;  %v68_v41 = vld [vmem:[#allocation7 + $0x78] sm:$0xff]  ;;  %v1099_v42 = vpack.c.bf16 %v152_v38, %v151_v37  ;;  %v154_v44 = vld [vmem:[#allocation7 + $0xe8] sm:$0xff]  ;;  %v52_v47 = vld [vmem:[#allocation2] sm:$0xff] }
  0x41   :  { %1089 = vmatprep.subr.bf16.mxu1 %v1341_v0  ;;  %v1081_v45 = vpack.c.bf16 %v68_v41, %v67_v40  ;;  %v1102_v46 = vpack.c.bf16 %v154_v44, %v153_v43  ;;  %v155_v48 = vld [vmem:[#allocation7 + $0xf0] sm:$0xff]  ;;  %v156_v49 = vld [vmem:[#allocation7 + $0xf8] sm:$0xff]  ;;  %v229_v51 = vld [vmem:[#allocation7 + $0x100] sm:$0xff] }
  0x42   :  { %1067 = vmatpush3.bf16.msra.mxu0 %v1066_v14  ;;  %v1105_v50 = vpack.c.bf16 %v156_v49, %v155_v48  ;;  %v230_v52 = vld [vmem:[#allocation7 + $0x108] sm:$0xff]  ;;  %v231_v54 = vld [vmem:[#allocation7 + $0x110] sm:$0xff]  ;;  %v232_v55 = vld [vmem:[#allocation7 + $0x118] sm:$0xff] }
  0x43   :  { %1068 = vmatprep.subr.bf16.mxu0 %v1341_v0  ;;  %v1108_v53 = vpack.c.bf16 %v230_v52, %v229_v51  ;;  %v1111_v56 = vpack.c.bf16 %v232_v55, %v231_v54  ;;  %v233_v57 = vld [vmem:[#allocation7 + $0x120] sm:$0xff]  ;;  %v234_v58 = vld [vmem:[#allocation7 + $0x128] sm:$0xff]  ;;  %v235_v60 = vld [vmem:[#allocation7 + $0x130] sm:$0xff] }
  0x44   :  { %1091 = vmatpush3.bf16.msra.mxu1 %v1090_v24  ;;  %v1114_v59 = vpack.c.bf16 %v234_v58, %v233_v57  ;;  %v236_v61 = vld [vmem:[#allocation7 + $0x138] sm:$0xff]  ;;  %v237_v63 = vld [vmem:[#allocation7 + $0x140] sm:$0xff]  ;;  %v238_v2 = vld [vmem:[#allocation7 + $0x148] sm:$0xff] }
  0x45   :  { %1092 = vmatprep.subr.bf16.mxu1 %v1341_v0  ;;  %v1117_v62 = vpack.c.bf16 %v236_v61, %v235_v60  ;;  %v1120_v3 = vpack.c.bf16 %v238_v2, %v237_v63  ;;  %v239_v4 = vld [vmem:[#allocation7 + $0x150] sm:$0xff]  ;;  %v240_v5 = vld [vmem:[#allocation7 + $0x158] sm:$0xff]  ;;  %v241_v7 = vld [vmem:[#allocation7 + $0x160] sm:$0xff] }
  0x46   :  { %1070 = vmatpush3.bf16.msra.mxu0 %v1069_v21  ;;  %v1123_v6 = vpack.c.bf16 %v240_v5, %v239_v4  ;;  %v242_v8 = vld [vmem:[#allocation7 + $0x168] sm:$0xff]  ;;  %v316_v10 = vld [vmem:[#allocation7 + $0x180] sm:$0xff]  ;;  %v318_v16 = vld [vmem:[#allocation7 + $0x190] sm:$0xff] }
  0x47   :  { %1071 = vmatprep.subr.bf16.mxu0 %v1341_v0  ;;  %v1126_v9 = vpack.c.bf16 %v242_v8, %v241_v7  ;;  %v317_v11 = vld [vmem:[#allocation7 + $0x188] sm:$0xff]  ;;  %v319_v17 = vld [vmem:[#allocation7 + $0x198] sm:$0xff]  ;;  %v320_v19 = vld [vmem:[#allocation7 + $0x1a0] sm:$0xff] }
  0x48   :  { %1094 = vmatpush3.bf16.msra.mxu1 %v1093_v30  ;;  %v1132_v13 = vpack.c.bf16 %v317_v11, %v316_v10  ;;  %v1135_v18 = vpack.c.bf16 %v319_v17, %v318_v16  ;;  %v321_v20 = vld [vmem:[#allocation7 + $0x1a8] sm:$0xff]  ;;  %v322_v22 = vld [vmem:[#allocation7 + $0x1b0] sm:$0xff]  ;;  %v323_v23 = vld [vmem:[#allocation7 + $0x1b8] sm:$0xff] }
  0x49   :  { %1095 = vmatprep.subr.bf16.mxu1 %v1341_v0  ;;  %v1138_v21 = vpack.c.bf16 %v321_v20, %v320_v19  ;;  %v1141_v24 = vpack.c.bf16 %v323_v23, %v322_v22  ;;  %v324_v25 = vld [vmem:[#allocation7 + $0x1c0] sm:$0xff]  ;;  %v325_v26 = vld [vmem:[#allocation7 + $0x1c8] sm:$0xff]  ;;  %v326_v28 = vld [vmem:[#allocation7 + $0x1d0] sm:$0xff] }
  0x4a   :  { %1073 = vmatpush3.bf16.msra.mxu0 %v1072_v27  ;;  %v1144_v27 = vpack.c.bf16 %v325_v26, %v324_v25  ;;  %v327_v29 = vld [vmem:[#allocation7 + $0x1d8] sm:$0xff]  ;;  %v328_v31 = vld [vmem:[#allocation7 + $0x1e0] sm:$0xff]  ;;  %v329_v32 = vld [vmem:[#allocation7 + $0x1e8] sm:$0xff] }
  0x4b   :  { %1074 = vmatprep.subr.bf16.mxu0 %v1341_v0  ;;  %v1147_v30 = vpack.c.bf16 %v327_v29, %v326_v28  ;;  %v243_v34 = vld [vmem:[#allocation7 + $0x170] sm:$0xff]  ;;  %v244_v35 = vld [vmem:[#allocation7 + $0x178] sm:$0xff]  ;;  %v409_v40 = vld [vmem:[#allocation7 + $0x200] sm:$0xff] }
  0x4c   :  { %1097 = vmatpush3.bf16.msra.mxu1 %v1096_v36  ;;  %v330_v36 = vld [vmem:[#allocation7 + $0x1f0] sm:$0xff]  ;;  %v1129_v37 = vpack.c.bf16 %v244_v35, %v243_v34  ;;  %v331_v38 = vld [vmem:[#allocation7 + $0x1f8] sm:$0xff]  ;;  %v410_v41 = vld [vmem:[#allocation7 + $0x208] sm:$0xff] }
  0x4d   :  { %1098 = vmatprep.subr.bf16.mxu1 %v1341_v0  ;;  %v1156_v43 = vpack.c.bf16 %v410_v41, %v409_v40  ;;  %v413_v49 = vld [vmem:[#allocation7 + $0x220] sm:$0xff]  ;;  %v415_v52 = vld [vmem:[#allocation7 + $0x230] sm:$0xff]  ;;  %v586_v40 = vld [vmem:[#allocation7 + $0x308] sm:$0xff] }
  0x4e   :  { %1076 = vmatpush3.bf16.msra.mxu0 %v1075_v33  ;;  %v1150_v33 = vpack.c.bf16 %v329_v32, %v328_v31  ;;  %v417_v55 = vld [vmem:[#allocation7 + $0x240] sm:$0xff]  ;;  %v419_v58 = vld [vmem:[#allocation7 + $0x250] sm:$0xff]  ;;  %v402_v32 = vld [vmem:[#allocation5] sm:$0xff] }
  0x4f   :  { %1077 = vmatprep.subr.bf16.mxu0 %v1341_v0  ;;  %v421_v61 = vld [vmem:[#allocation7 + $0x260] sm:$0xff]  ;;  %v423_v2 = vld [vmem:[#allocation7 + $0x270] sm:$0xff] }
  0x50   :  { %1100 = vmatpush3.bf16.msra.mxu1 %v1099_v42  ;;  %v497_v5 = vld [vmem:[#allocation7 + $0x280] sm:$0xff]  ;;  %v499_v7 = vld [vmem:[#allocation7 + $0x290] sm:$0xff] }
  0x51   :  { %1101 = vmatprep.subr.bf16.mxu1 %v1341_v0  ;;  %v501_v11 = vld [vmem:[#allocation7 + $0x2a0] sm:$0xff]  ;;  %v507_v20 = vld [vmem:[#allocation7 + $0x2d0] sm:$0xff] }
  0x52   :  { %1079 = vmatpush3.bf16.msra.mxu0 %v1078_v39  ;;  %v1153_v39 = vpack.c.bf16 %v331_v38, %v330_v36  ;;  %v505_v17 = vld [vmem:[#allocation7 + $0x2c0] sm:$0xff]  ;;  %v511_v36 = vld [vmem:[#allocation7 + $0x2f0] sm:$0xff] }
  0x53   :  { %1080 = vmatprep.subr.bf16.mxu0 %v1341_v0  ;;  %v509_v23 = vld [vmem:[#allocation7 + $0x2e0] sm:$0xff]  ;;  %v587_v41 = vld [vmem:[#allocation7 + $0x310] sm:$0xff] }
  0x54   :  { %1103 = vmatpush3.bf16.msra.mxu1 %v1102_v46  ;;  %v411_v46 = vld [vmem:[#allocation7 + $0x210] sm:$0xff] }
  0x55   :  { %1104 = vmatprep.subr.bf16.mxu1 %v1341_v0 }
  0x56   :  { %1082 = vmatpush3.bf16.msra.mxu0 %v1081_v45 }
  0x57   :  { %1107 = vmatprep.subr.bf16.mxu0 %v1341_v0 }
  0x58   :  { %1106 = vmatpush3.bf16.msra.mxu1 %v1105_v50  ;;  %v414_v50 = vld [vmem:[#allocation7 + $0x228] sm:$0xff] }
  0x59   :  { %847 = vmatmul.mubr.f32.vlgmr.msra.gmra.mrb[0].mxu0 %v52_v47  ;;  %1131 = vmatprep.subr.bf16.mxu1 %v1341_v0  ;;  %v412_v47 = vld [vmem:[#allocation7 + $0x218] sm:$0xff]  ;;  %v1162_v51 = vpack.c.bf16 %v414_v50, %v413_v49  ;;  %v593_v50 = vld [vmem:[#allocation7 + $0x340] sm:$0xff] }
  0x5a   :  { %916 = vmatprep.mubr.msk.f32.mxu0 %vm1342_vm0, %v1343_v1  ;;  %1109 = vmatpush3.bf16.msra.mxu0 %v1108_v53  ;;  %v1159_v48 = vpack.c.bf16 %v412_v47, %v411_v46  ;;  %v416_v53 = vld [vmem:[#allocation7 + $0x238] sm:$0xff]  ;;  %v590_v46 = vld [vmem:[#allocation7 + $0x328] sm:$0xff] }
  0x5b   :  { %1110 = vmatprep.subr.bf16.mxu0 %v1341_v0  ;;  %v1165_v54 = vpack.c.bf16 %v416_v53, %v415_v52  ;;  %v595_v53 = vld [vmem:[#allocation7 + $0x350] sm:$0xff] }
  0x5e   :  { %1112 = vmatpush3.bf16.msra.mxu0 %v1111_v56  ;;  %v418_v56 = vld [vmem:[#allocation7 + $0x248] sm:$0xff] }
  0x5f   :  { %1113 = vmatprep.subr.bf16.mxu0 %v1341_v0  ;;  %v1168_v57 = vpack.c.bf16 %v418_v56, %v417_v55  ;;  %v597_v56 = vld [vmem:[#allocation7 + $0x360] sm:$0xff] }
  0x62   :  { %1115 = vmatpush3.bf16.msra.mxu0 %v1114_v59  ;;  %v420_v59 = vld [vmem:[#allocation7 + $0x258] sm:$0xff] }
  0x63   :  { %1116 = vmatprep.subr.bf16.mxu0 %v1341_v0  ;;  %v1171_v60 = vpack.c.bf16 %v420_v59, %v419_v58 }
  0x66   :  { %1118 = vmatpush3.bf16.msra.mxu0 %v1117_v62  ;;  %v422_v62 = vld [vmem:[#allocation7 + $0x268] sm:$0xff] }
  0x67   :  { %1119 = vmatprep.subr.bf16.mxu0 %v1341_v0  ;;  %v1174_v63 = vpack.c.bf16 %v422_v62, %v421_v61  ;;  %v599_v62 = vld [vmem:[#allocation7 + $0x370] sm:$0xff] }
  0x6a   :  { %1121 = vmatpush3.bf16.msra.mxu0 %v1120_v3  ;;  %v424_v3 = vld [vmem:[#allocation7 + $0x278] sm:$0xff] }
  0x6b   :  { %1122 = vmatprep.subr.bf16.mxu0 %v1341_v0  ;;  %v1177_v4 = vpack.c.bf16 %v424_v3, %v423_v2 }
  0x6e   :  { %1124 = vmatpush3.bf16.msra.mxu0 %v1123_v6  ;;  %v498_v6 = vld [vmem:[#allocation7 + $0x288] sm:$0xff] }
  0x6f   :  { %1125 = vmatprep.subr.bf16.mxu0 %v1341_v0  ;;  %v1180_v8 = vpack.c.bf16 %v498_v6, %v497_v5 }
  0x72   :  { %1127 = vmatpush3.bf16.msra.mxu0 %v1126_v9  ;;  %v500_v9 = vld [vmem:[#allocation7 + $0x298] sm:$0xff] }
  0x73   :  { %1128 = vmatprep.subr.bf16.mxu0 %v1341_v0  ;;  %v1183_v10 = vpack.c.bf16 %v500_v9, %v499_v7 }
  0x76   :  { %1130 = vmatpush3.bf16.msra.mxu0 %v1129_v37  ;;  %v512_v37 = vld [vmem:[#allocation7 + $0x2f8] sm:$0xff] }
  0x77   :  { %1155 = vmatprep.subr.bf16.mxu0 %v1341_v0  ;;  %v1201_v38 = vpack.c.bf16 %v512_v37, %v511_v36 }
 0x12c   :  { %v135_v12 = vpop.f32.mrb[0].mxu0 }
 0x12d   :  { %v139_v14 = vmax.f32 %v135_v12, 0.0  ;;  %v848_v15 = vpop.f32.mrb[1].mxu0  ;;  %v502_v12 = vld [vmem:[#allocation7 + $0x2a8] sm:$0xff] }
 0x12e   :  { %v504_v15 = vld [vmem:[#allocation7 + $0x2b8] sm:$0xff] }
 0x12f   :  { %882 = vmatmul.mubr.f32.vlgmr.msra.gmra.mrb[0].mxu1 %v139_v14  ;;  %v503_v14 = vld [vmem:[#allocation7 + $0x2b0] sm:$0xff] }
 0x130   :  { %1133 = vmatpush3.bf16.msra.mxu1 %v1132_v13  ;;  %951 = vmatprep.mubr.msk.f32.mxu1 %vm1342_vm0, %v1343_v1  ;;  %v1186_v13 = vpack.c.bf16 %v502_v12, %v501_v11  ;;  %v1189_v16 = vpack.c.bf16 %v504_v15, %v503_v14 }
 0x131   :  { %1134 = vmatprep.subr.bf16.mxu1 %v1341_v0 }
 0x134   :  { %1136 = vmatpush3.bf16.msra.mxu1 %v1135_v18  ;;  %v506_v18 = vld [vmem:[#allocation7 + $0x2c8] sm:$0xff] }
 0x135   :  { %1137 = vmatprep.subr.bf16.mxu1 %v1341_v0  ;;  %v1192_v19 = vpack.c.bf16 %v506_v18, %v505_v17 }
 0x138   :  { %1139 = vmatpush3.bf16.msra.mxu1 %v1138_v21  ;;  %v508_v21 = vld [vmem:[#allocation7 + $0x2d8] sm:$0xff] }
 0x139   :  { %1140 = vmatprep.subr.bf16.mxu1 %v1341_v0  ;;  %v1195_v22 = vpack.c.bf16 %v508_v21, %v507_v20 }
 0x13c   :  { %1142 = vmatpush3.bf16.msra.mxu1 %v1141_v24  ;;  %v510_v24 = vld [vmem:[#allocation7 + $0x2e8] sm:$0xff] }
 0x13d   :  { %1143 = vmatprep.subr.bf16.mxu1 %v1341_v0  ;;  %v1198_v25 = vpack.c.bf16 %v510_v24, %v509_v23 }
 0x140   :  { %1145 = vmatpush3.bf16.msra.mxu1 %v1144_v27 }
 0x141   :  { %1146 = vmatprep.subr.bf16.mxu1 %v1341_v0 }
 0x144   :  { %1148 = vmatpush3.bf16.msra.mxu1 %v1147_v30 }
 0x145   :  { %1149 = vmatprep.subr.bf16.mxu1 %v1341_v0 }
 0x148   :  { %1151 = vmatpush3.bf16.msra.mxu1 %v1150_v33 }
 0x149   :  { %1152 = vmatprep.subr.bf16.mxu1 %v1341_v0 }
 0x14c   :  { %1154 = vmatpush3.bf16.msra.mxu1 %v1153_v39  ;;  %v585_v39 = vld [vmem:[#allocation7 + $0x300] sm:$0xff] }
 0x14d   :  { %1179 = vmatprep.subr.bf16.mxu1 %v1341_v0 }
 0x202   :  { %v223_v42 = vpop.f32.mrb[0].mxu1 }
 0x203   :  { %v227_v44 = vmax.f32 %v223_v42, 0.0  ;;  %v883_v45 = vpop.f32.mrb[1].mxu1  ;;  %v1204_v42 = vpack.c.bf16 %v586_v40, %v585_v39 }
 0x204   :  { %v589_v45 = vld [vmem:[#allocation7 + $0x320] sm:$0xff] }
 0x205   :  { %917 = vmatmul.mubr.f32.vlgmr.msra.gmra.mrb[2].mxu0 %v227_v44  ;;  %952 = vmatmul.mubr.f32.vlgmr.msra.gmra.mrb[2].mxu1 %v227_v44  ;;  %v1210_v47 = vpack.c.bf16 %v590_v46, %v589_v45 }
 0x206   :  { %1157 = vmatpush3.bf16.msra.mxu0 %v1156_v43  ;;  %986 = vmatprep.mubr.msk.f32.mxu0 %vm1342_vm0, %v1343_v1  ;;  %v588_v43 = vld [vmem:[#allocation7 + $0x318] sm:$0xff] }
 0x207   :  { %1158 = vmatprep.subr.bf16.mxu0 %v1341_v0  ;;  %1021 = vmatprep.mubr.msk.f32.mxu1 %vm1342_vm0, %v1343_v1  ;;  %v1207_v44 = vpack.c.bf16 %v588_v43, %v587_v41 }
 0x208   :  { %1181 = vmatpush3.bf16.msra.mxu1 %v1180_v8 }
 0x209   :  { %1182 = vmatprep.subr.bf16.mxu1 %v1341_v0 }
 0x20a   :  { %1160 = vmatpush3.bf16.msra.mxu0 %v1159_v48  ;;  %v592_v48 = vld [vmem:[#allocation7 + $0x338] sm:$0xff] }
 0x20b   :  { %1161 = vmatprep.subr.bf16.mxu0 %v1341_v0 }
 0x20c   :  { %1184 = vmatpush3.bf16.msra.mxu1 %v1183_v10 }
 0x20d   :  { %1185 = vmatprep.subr.bf16.mxu1 %v1341_v0 }
 0x20e   :  { %1163 = vmatpush3.bf16.msra.mxu0 %v1162_v51  ;;  %v594_v51 = vld [vmem:[#allocation7 + $0x348] sm:$0xff] }
 0x20f   :  { %1164 = vmatprep.subr.bf16.mxu0 %v1341_v0  ;;  %v1216_v52 = vpack.c.bf16 %v594_v51, %v593_v50 }
 0x210   :  { %1187 = vmatpush3.bf16.msra.mxu1 %v1186_v13 }
 0x211   :  { %1188 = vmatprep.subr.bf16.mxu1 %v1341_v0 }
 0x212   :  { %1166 = vmatpush3.bf16.msra.mxu0 %v1165_v54  ;;  %v596_v54 = vld [vmem:[#allocation7 + $0x358] sm:$0xff] }
 0x213   :  { %1167 = vmatprep.subr.bf16.mxu0 %v1341_v0  ;;  %v1219_v55 = vpack.c.bf16 %v596_v54, %v595_v53 }
 0x214   :  { %1190 = vmatpush3.bf16.msra.mxu1 %v1189_v16 }
 0x215   :  { %1191 = vmatprep.subr.bf16.mxu1 %v1341_v0 }
 0x216   :  { %1169 = vmatpush3.bf16.msra.mxu0 %v1168_v57  ;;  %v598_v57 = vld [vmem:[#allocation7 + $0x368] sm:$0xff] }
 0x217   :  { %1170 = vmatprep.subr.bf16.mxu0 %v1341_v0  ;;  %v1222_v58 = vpack.c.bf16 %v598_v57, %v597_v56 }
 0x218   :  { %1193 = vmatpush3.bf16.msra.mxu1 %v1192_v19 }
 0x219   :  { %1194 = vmatprep.subr.bf16.mxu1 %v1341_v0 }
 0x21a   :  { %1172 = vmatpush3.bf16.msra.mxu0 %v1171_v60 }
 0x21b   :  { %1173 = vmatprep.subr.bf16.mxu0 %v1341_v0 }
 0x21c   :  { %1196 = vmatpush3.bf16.msra.mxu1 %v1195_v22 }
 0x21d   :  { %1197 = vmatprep.subr.bf16.mxu1 %v1341_v0 }
 0x21e   :  { %1175 = vmatpush3.bf16.msra.mxu0 %v1174_v63  ;;  %v600_v63 = vld [vmem:[#allocation7 + $0x378] sm:$0xff] }
 0x21f   :  { %1176 = vmatprep.subr.bf16.mxu0 %v1341_v0  ;;  %v1225_v2 = vpack.c.bf16 %v600_v63, %v599_v62 }
 0x220   :  { %1199 = vmatpush3.bf16.msra.mxu1 %v1198_v25 }
 0x221   :  { %1200 = vmatprep.subr.bf16.mxu1 %v1341_v0 }
 0x222   :  { %1178 = vmatpush3.bf16.msra.mxu0 %v1177_v4 }
 0x223   :  { %1203 = vmatprep.subr.bf16.mxu0 %v1341_v0 }
 0x224   :  { %1202 = vmatpush3.bf16.msra.mxu1 %v1201_v38 }
 0x2d8   :  { %v311_v26 = vpop.f32.mrb[2].mxu0  ;;  %v398_v27 = vpop.f32.mrb[2].mxu1 }
 0x2d9   :  { %v403_v28 = vmul.f32 0.5, %v398_v27  ;;  %v918_v29 = vpop.f32.mrb[3].mxu0  ;;  %v953_v30 = vpop.f32.mrb[3].mxu1 }
 0x2db   :  { %v404_v31 = vmul.f32 1.442695, %v403_v28 }
 0x2dd   :  { %1236 = vpow2.f32 %v404_v31 }
 0x2e7   :  { %v1237_v33 = vpop.eup %1236 }
 0x2e8   :  { %v406_v34 = vmul.f32 %v1237_v33, %v402_v32 }
 0x2ea   :  { %v407_v35 = vadd.f32 %v406_v34, %v311_v26 }
 0x2ec   :  { %987 = vmatmul.mubr.f32.vlgmr.msra.gmra.mrb[4].mxu0 %v407_v35 }
 0x2ed   :  { %1056 = vmatprep.mubr.msk.f32.mxu0 %vm1342_vm0, %v1343_v1  ;;  %1205 = vmatpush3.bf16.msra.mxu0 %v1204_v42  ;;  %v591_v1 = vld [vmem:[#allocation7 + $0x330] sm:$0xff] }
 0x2ee   :  { %1206 = vmatprep.subr.bf16.mxu0 %v1341_v0  ;;  %v1213_v49 = vpack.c.bf16 %v592_v48, %v591_v1 }
 0x2f1   :  { %1208 = vmatpush3.bf16.msra.mxu0 %v1207_v44 }
 0x2f2   :  { %1209 = vmatprep.subr.bf16.mxu0 %v1341_v0 }
 0x2f5   :  { %1211 = vmatpush3.bf16.msra.mxu0 %v1210_v47 }
 0x2f6   :  { %1212 = vmatprep.subr.bf16.mxu0 %v1341_v0 }
 0x2f9   :  { %1214 = vmatpush3.bf16.msra.mxu0 %v1213_v49 }
 0x2fa   :  { %1215 = vmatprep.subr.bf16.mxu0 %v1341_v0 }
 0x2fd   :  { %1217 = vmatpush3.bf16.msra.mxu0 %v1216_v52 }
 0x2fe   :  { %1218 = vmatprep.subr.bf16.mxu0 %v1341_v0 }
 0x301   :  { %1220 = vmatpush3.bf16.msra.mxu0 %v1219_v55 }
 0x302   :  { %1221 = vmatprep.subr.bf16.mxu0 %v1341_v0 }
 0x305   :  { %1223 = vmatpush3.bf16.msra.mxu0 %v1222_v58 }
 0x306   :  { %1224 = vmatprep.subr.bf16.mxu0 %v1341_v0 }
 0x309   :  { %1226 = vmatpush3.bf16.msra.mxu0 %v1225_v2 }
 0x3bf   :  { %v491_v59 = vpop.f32.mrb[4].mxu0 }
 0x3c0   :  { %v495_v60 = vmax.f32 %v491_v59, 0.0  ;;  %v988_v61 = vpop.f32.mrb[5].mxu0 }
 0x3c2   :  { %1022 = vmatmul.mubr.f32.vlgmr.msra.gmra.mrb[4].mxu1 %v495_v60 }
 0x495   :  { %v579_v3 = vpop.f32.mrb[4].mxu1 }
 0x496   :  { %v583_v4 = vmax.f32 %v579_v3, 0.0  ;;  %v1023_v5 = vpop.f32.mrb[5].mxu1 }
 0x498   :  { %1057 = vmatmul.mubr.f32.vlgmr.msra.gmra.mrb[6].mxu0 %v583_v4 }
 0x56b   :  { %v667_v6 = vpop.f32.mrb[6].mxu0 }
 0x56c   :  { %v694_v7 = vmul.f32 -1.442695, %v667_v6  ;;  %v1058_v8 = vpop.f32.mrb[7].mxu0 }
 0x56e   :  { %1238 = vpow2.f32 %v694_v7 }
 0x578   :  { %v1239_v9 = vpop.eup %1238 }
 0x579   :  { %v674_v10 = vadd.f32 1.0, %v1239_v9 }
 0x57b   :  { %1240 = vrcp.f32 %v674_v10 }
 0x585   :  { %v1241_v0 = vpop.eup %1240 }
 0x586   :  { %677 = vst [vmem:[#allocation8] sm:$0xff] %v1241_v0 }
 0x587   :  { %1319 = shalt.err (!%p1316_p0)
}
 0x588   :  { %s1320_s25 = scalar_lea.hbm %s1486_s3, 128 }
 0x589   :  { %p1321_p1 = scmp.ne.s32.totalorder %s1486_s3, %s1320_s25  ;;  %p1324_p2 = scmp.lt.u32.totalorder %s1320_s25, %s1486_s3 }
 0x58b   :  { %p1326_p3 = pnand %p1324_p2, %p1321_p1 }
 0x58d   :  { %1329 = shalt.err (!%p1326_p3)
}
 0x58e   :  { %687 = dma.vmem_to_hbm [thread:$0]  %s685_s21, 128, %s1486_s3, [#allocation4]  }
 0x58f   :  { %1334 = dma.done.wait [#allocation4], 128  }
 0x590   :  { %1335 = vsyncadd [#allocation4], 4294967168 }
 0x591   :  { %691 = vsyncpa [#allocation3], 1 }
 0x592   :  { %692 = vsyncpa [#allocation6], 1 }
 0x593   :  { %693 = vsyncpa [#allocation4], 1 }

</bundles_post_ra>
